<compile_context>
chip_gen: v6e
topology: v6e:2x2x1
jax: 0.10.0
libtpu: 0.0.40
codegen_flags: <defaults>
</compile_context>

<pallas_src>
import jax
import jax.numpy as jnp
from jax.experimental import pallas as pl
from jax.experimental.pallas import tpu as pltpu

CLS_TOKEN_POSITION = 0   # ClsPooler.cls_token_position


# ---- kernel: pure lane-dense copy of the CLS rows gathered by the BlockSpec --
def cls_pooler_kernel(x_ref, o_ref):
    # x_ref: (TB, H) — only the CLS-token hidden vectors (row-gather DMA).
    # o_ref: (TB, H) — lane-dense, full-width store.
    o_ref[...] = x_ref[...]


def cls_pooler(last_hidden_state, attention_mask=None, pooler_output=None,
               use_pooler_output=True, cls_token_position=CLS_TOKEN_POSITION):
    """Pallas equivalent of ClsPooler.forward.

    `attention_mask` is accepted for signature parity with the PyTorch module
    but (exactly like the reference) is not used.
    """
    # Static branch mirroring the isinstance / pooler_output check in torch.
    if use_pooler_output and pooler_output is not None:
        return pooler_output

    b, s, h = last_hidden_state.shape

    if h % 128 != 0:
        # Non-lane-aligned hidden width: a plain XLA slice (which fuses with
        # the producer) beats a standalone kernel here.
        return last_hidden_state[:, cls_token_position, :]

    # Free reshape: collapse (S, H) -> S*H.  With block width = H, the block
    # index along the flattened axis IS the token position, so the index_map
    # below selects exactly the CLS token per batch row.
    x2 = last_hidden_state.reshape(b, s * h)

    # Batch tile: full batch when small (block == full dim is always legal),
    # otherwise a sublane-aligned tile (512 is a multiple of 8 and 16) that
    # keeps per-buffer VMEM tiny (<= 512*H*dtype) on every chip generation.
    tb = b if b <= 512 else 512

    return pl.pallas_call(
        cls_pooler_kernel,
        out_shape=jax.ShapeDtypeStruct((b, h), last_hidden_state.dtype),
        grid=(pl.cdiv(b, tb),),
        in_specs=[
            # Row-gather DMA: (tb, h) window of the (b, s*h) view, column
            # block = CLS token position.  Never reads the other S-1 tokens.
            pl.BlockSpec((tb, h), lambda i: (i, cls_token_position)),
        ],
        out_specs=pl.BlockSpec((tb, h), lambda i: (i, 0)),
        compiler_params=pltpu.CompilerParams(
            dimension_semantics=("parallel",),   # megacore split on v7x
        ),
    )(x2)


# ---- demo / self-check -------------------------------------------------------
if __name__ == "__main__":
    # Small shapes; B=8 keeps the f32 output block sublane-dense, H=128 lane-dense.
    B, S, H = 8, 8, 128

    key = jax.random.PRNGKey(0)
    k_hidden, k_pool = jax.random.split(key)

    last_hidden_state = jax.random.normal(k_hidden, (B, S, H), jnp.float32)
    attention_mask = jnp.ones((B, S), jnp.int32)

    # Path 1: no pooler_output -> Pallas CLS-token row-gather kernel (f32).
    out = cls_pooler(last_hidden_state, attention_mask)
    jax.block_until_ready(out)
    ref = last_hidden_state[:, CLS_TOKEN_POSITION, :]
    assert out.shape == (B, H)
    assert bool(jnp.all(jnp.isfinite(out)))
    assert bool(jnp.allclose(out, ref)), "CLS pooling mismatch vs reference (f32)"

    # Same path in bf16 (sublane quantum 16 handled by block == full batch dim).
    lhs_bf16 = last_hidden_state.astype(jnp.bfloat16)
    out_bf16 = cls_pooler(lhs_bf16, attention_mask)
    jax.block_until_ready(out_bf16)
    assert bool(jnp.allclose(out_bf16, lhs_bf16[:, CLS_TOKEN_POSITION, :])), \
        "CLS pooling mismatch vs reference (bf16)"

    # Path 2: pooler_output provided -> passthrough (static Python branch,
    # identical to the torch module's early return).
    pooler_output = jax.random.normal(k_pool, (B, H), jnp.float32)
    out2 = cls_pooler(last_hidden_state, attention_mask,
                      pooler_output=pooler_output, use_pooler_output=True)
    jax.block_until_ready(out2)
    assert bool(jnp.allclose(out2, pooler_output))

    print("KERNEL_OK")
</pallas_src>

<mosaic_0001>
module attributes {stable_mosaic.version = 11 : i64} {
  func.func @cls_pooler_kernel(%arg0: i32, %arg1: memref<8x128xf32, #tpu.memory_space<vmem>>, %arg2: memref<8x128xf32, #tpu.memory_space<vmem>>) attributes {dimension_semantics = [#tpu.dimension_semantics<parallel>], iteration_bounds = array<i64: 1>, scalar_prefetch = 0 : i64, scratch_operands = 0 : i64, tpu.core_type = #tpu.core_type<tc>, window_params = [{transform_indices = @transform_0, window_bounds = array<i64: 8, 128>}, {transform_indices = @transform_1, window_bounds = array<i64: 8, 128>}]} {
    %c0 = arith.constant 0 : index
    %c0_0 = arith.constant 0 : index
    %0 = vector.load %arg1[%c0, %c0_0] : memref<8x128xf32, #tpu.memory_space<vmem>>, vector<8x128xf32>
    %c0_1 = arith.constant 0 : index
    %c0_2 = arith.constant 0 : index
    %1 = vector.load %arg2[%c0_1, %c0_2] : memref<8x128xf32, #tpu.memory_space<vmem>>, vector<8x128xf32>
    tpu.vector_store %arg2[%c0_1, %c0_2], %0 {strides = array<i32>} : memref<8x128xf32, #tpu.memory_space<vmem>>, vector<8x128xf32>,
    return
  }
  func.func @transform_0(%arg0: i32) -> (i32, i32) {
    %c0_i32 = arith.constant 0 : i32
    %c0_i32_0 = arith.constant 0 : i32
    return %arg0, %c0_i32 : i32, i32
  }
  func.func @transform_1(%arg0: i32) -> (i32, i32) {
    %c0_i32 = arith.constant 0 : i32
    %c0_i32_0 = arith.constant 0 : i32
    return %arg0, %c0_i32 : i32, i32
  }
}

</mosaic_0001>

<bundles_post_ra>
// kernel: tpu_custom_call.1
= control target key start
LH: loop header
LB: loop body
LE: loop exit
PB: predicated region body
PF: predicated region fallthrough
CT: control target
= control target key end

     0   :  { %6 = vsyncpa [#allocation3], 0  ;;  %s102_s0 = inlined_call_operand.hbm [shape: f32[8,1024], index: 0, kind: input, shape index: {}]   ;;  %s103_s1 = inlined_call_operand.hbm [shape: f32[8,128], index: 1, kind: output, shape index: {}]  }
   0x1   :  { %7 = vsyncpa [#allocation4], 0  ;;  %s84_s6 = smov [#allocation2]  }
   0x2   :  { %s14_s7 = sshll.u32 %s84_s6, 4  ;;  %s15_s7 = int_to_ptr.vmem [resolvable:$true] %s14_s7 }
   0x3   :  { %s48_s8 = scalar_lea.vmem %s15_s7, 128  ;;  %p53_p1 = scmp.lt.s32.totalorder %s15_s7, %s15_s7 }
   0x4   :  { %p49_p0 = scmp.ne.s32.totalorder %s15_s7, %s48_s8  ;;  %p54_p2 = scmp.lt.s32.totalorder %s48_s8, %s48_s8 }
   0x6   :  { %p55_p3 = por %p54_p2, %p53_p1 }
   0x8   :  { %p56_p4 = pnand %p55_p3, %p49_p0 }
   0xa   :  { %59 = shalt.err (!%p56_p4)
}
   0xb   :  { %17 = dma.hbm_to_vmem [thread:$0]  %s102_s0, 128, %s15_s7, [#allocation3]  }
   0xc   :  { %80 = dma.done.wait [#allocation3], 128  }
   0xd   :  { %81 = vsyncadd [#allocation3], 4294967168  ;;  %s85_s11 = smov [#allocation5]   ;;  %v21_v0 = vld [vmem:[#allocation2] sm:$0xff] }
   0xe   :  { %s29_s12 = sshll.u32 %s85_s11, 4  ;;  %22 = vst [vmem:[#allocation5] sm:$0xff] %v21_v0  ;;  %s30_s12 = int_to_ptr.vmem [resolvable:$true] %s29_s12 }
   0xf   :  { %s60_s13 = scalar_lea.vmem %s30_s12, 128  ;;  %p65_p6 = scmp.lt.s32.totalorder %s30_s12, %s30_s12 }
  0x10   :  { %p61_p5 = scmp.ne.s32.totalorder %s30_s12, %s60_s13  ;;  %p66_p7 = scmp.lt.s32.totalorder %s60_s13, %s60_s13 }
  0x12   :  { %p67_p8 = por %p66_p7, %p65_p6 }
  0x14   :  { %p68_p9 = pnand %p67_p8, %p61_p5 }
  0x16   :  { %71 = shalt.err (!%p68_p9)
}
  0x17   :  { %32 = dma.vmem_to_hbm [thread:$0]  %s30_s12, 128, %s103_s1, [#allocation4]  }
  0x18   :  { %82 = dma.done.wait [#allocation4], 128  }
  0x19   :  { %83 = vsyncadd [#allocation4], 4294967168 }
  0x1a   :  { %36 = vsyncpa [#allocation3], 1 }
  0x1b   :  { %37 = vsyncpa [#allocation4], 1 }

</bundles_post_ra>
